<compile_context>
chip_gen: v6e
topology: v6e:2x2x1
jax: 0.10.0
libtpu: 0.0.40
codegen_flags: <defaults>
</compile_context>

<pallas_src>
import numpy as np

import jax
import jax.numpy as jnp
from jax.experimental import pallas as pl
from jax.experimental.pallas import tpu as pltpu

_VMEM_LIMIT = 32 * 1024 * 1024  # headroom on v7x (64 MiB physical VMEM)
_EPS = 1e-5


# --------------------------------------------------------------------------
# Kernel 1: 1x1 ("lateral") convolution as a tiled matmul.
# --------------------------------------------------------------------------
def _pointwise_kernel(x_ref, w_ref, b_ref, o_ref):
    acc = jnp.dot(x_ref[...], w_ref[...], preferred_element_type=jnp.float32)
    o_ref[...] = (acc + b_ref[...]).astype(o_ref.dtype)


def _pick_tile_m(m, max_tile=512):
    for t in (512, 256, 128, 64, 32, 16, 8):
        if t <= max_tile and m % t == 0:
            return t
    return m


def pointwise_conv(x_nhwc, w_io, bias):
    """1x1 conv: x (B,H,W,Cin) NHWC, w_io (Cin,Cout), bias (Cout,)."""
    B, H, W, Cin = x_nhwc.shape
    Cout = w_io.shape[1]
    M = B * H * W
    x2 = x_nhwc.reshape(M, Cin)
    tm = _pick_tile_m(M)
    grid = (M // tm,)
    out = pl.pallas_call(
        _pointwise_kernel,
        out_shape=jax.ShapeDtypeStruct((M, Cout), x_nhwc.dtype),
        grid=grid,
        in_specs=[
            pl.BlockSpec((tm, Cin), lambda i: (i, 0)),
            pl.BlockSpec((Cin, Cout), lambda i: (0, 0)),
            pl.BlockSpec((1, Cout), lambda i: (0, 0)),
        ],
        out_specs=pl.BlockSpec((tm, Cout), lambda i: (i, 0)),
        compiler_params=pltpu.CompilerParams(
            dimension_semantics=("parallel",),
            vmem_limit_bytes=_VMEM_LIMIT,
        ),
    )(x2, w_io, bias.reshape(1, Cout))
    return out.reshape(B, H, W, Cout)


# --------------------------------------------------------------------------
# Kernel 2: bilinear upsample (align_corners=False, PyTorch semantics) + add.
# --------------------------------------------------------------------------
def _build_interp_matrix(out_size, in_size):
    """Row-stochastic matrix R (out,in) implementing torch bilinear, align_corners=False."""
    m = np.zeros((out_size, in_size), dtype=np.float32)
    if in_size == 1:
        m[:, 0] = 1.0
        return m
    scale = in_size / out_size
    for t in range(out_size):
        src = (t + 0.5) * scale - 0.5
        src = max(src, 0.0)
        i0 = min(int(np.floor(src)), in_size - 1)
        i1 = min(i0 + 1, in_size - 1)
        w1 = src - i0
        m[t, i0] += 1.0 - w1
        m[t, i1] += w1
    return m


def _upsample_add_kernel(top_ref, lat_ref, r_ref, o_ref):
    top = top_ref[0]                                     # (Hs, Ws, C)
    lat = lat_ref[0].astype(jnp.float32)                 # (Ht, Wt, C)
    Hs, Ws, C = top.shape
    Ht, Wt, _ = lat.shape
    up = jnp.dot(
        r_ref[...],
        top.reshape(Hs * Ws, C).astype(jnp.float32),
        preferred_element_type=jnp.float32,
    )                                                    # (Ht*Wt, C), C lane-dense
    o_ref[0] = (up.reshape(Ht, Wt, C) + lat).astype(o_ref.dtype)


def upsample_add(top_nhwc, lat_nhwc):
    B, Hs, Ws, C = top_nhwc.shape
    _, Ht, Wt, _ = lat_nhwc.shape
    rh = _build_interp_matrix(Ht, Hs)
    rw = _build_interp_matrix(Wt, Ws)
    r = jnp.asarray(np.kron(rh, rw), dtype=jnp.float32)  # (Ht*Wt, Hs*Ws), static
    return pl.pallas_call(
        _upsample_add_kernel,
        out_shape=jax.ShapeDtypeStruct((B, Ht, Wt, C), lat_nhwc.dtype),
        grid=(B,),
        in_specs=[
            pl.BlockSpec((1, Hs, Ws, C), lambda b: (b, 0, 0, 0)),
            pl.BlockSpec((1, Ht, Wt, C), lambda b: (b, 0, 0, 0)),
            pl.BlockSpec((Ht * Wt, Hs * Ws), lambda b: (0, 0)),
        ],
        out_specs=pl.BlockSpec((1, Ht, Wt, C), lambda b: (b, 0, 0, 0)),
        compiler_params=pltpu.CompilerParams(
            dimension_semantics=("parallel",),
            vmem_limit_bytes=_VMEM_LIMIT,
        ),
    )(top_nhwc, lat_nhwc, r)


# --------------------------------------------------------------------------
# Kernel 3: 3x3 conv (pad=1, stride=1) + folded BatchNorm + ReLU.
# --------------------------------------------------------------------------
def _conv3x3_kernel(x_ref, w_ref, b_ref, o_ref):
    xp = x_ref[0].astype(jnp.float32)                    # (H+2, W+2, Cin)
    Hp, Wp, Cin = xp.shape
    H, W = Hp - 2, Wp - 2
    Cout = o_ref.shape[-1]
    acc = jnp.zeros((H * W, Cout), jnp.float32)
    # 9-tap shift-and-matmul; each tap is a lane-dense MXU matmul.
    for dy in range(3):
        for dx in range(3):
            patch = xp[dy:dy + H, dx:dx + W, :].reshape(H * W, Cin)
            acc = acc + jnp.dot(
                patch, w_ref[dy * 3 + dx], preferred_element_type=jnp.float32
            )
    acc = acc + b_ref[...].astype(jnp.float32)
    o_ref[0] = jnp.maximum(acc, 0.0).reshape(H, W, Cout).astype(o_ref.dtype)


def conv3x3_bn_relu(x_nhwc, w9, bias):
    """x (B,H,W,Cin), w9 (9,Cin,Cout) BN-folded, bias (Cout,) BN-folded."""
    B, H, W, Cin = x_nhwc.shape
    Cout = w9.shape[-1]
    xp = jnp.pad(x_nhwc, ((0, 0), (1, 1), (1, 1), (0, 0)))
    return pl.pallas_call(
        _conv3x3_kernel,
        out_shape=jax.ShapeDtypeStruct((B, H, W, Cout), x_nhwc.dtype),
        grid=(B,),
        in_specs=[
            pl.BlockSpec((1, H + 2, W + 2, Cin), lambda b: (b, 0, 0, 0)),
            pl.BlockSpec((9, Cin, Cout), lambda b: (0, 0, 0)),
            pl.BlockSpec((1, Cout), lambda b: (0, 0)),
        ],
        out_specs=pl.BlockSpec((1, H, W, Cout), lambda b: (b, 0, 0, 0)),
        compiler_params=pltpu.CompilerParams(
            dimension_semantics=("parallel",),
            vmem_limit_bytes=_VMEM_LIMIT,
        ),
    )(xp, w9, bias.reshape(1, Cout))


# --------------------------------------------------------------------------
# FpnTopDown forward (Pallas path).
# --------------------------------------------------------------------------
def prepare_kernel_params(tp, eps=_EPS):
    """Convert torch-layout params into kernel layouts; fold BN into the 3x3 conv."""
    lateral = []
    for w, b in zip(tp["lat_w"], tp["lat_b"]):
        lateral.append((jnp.transpose(w[:, :, 0, 0], (1, 0)), b))     # (Cin,Cout)
    fpn = []
    for w, b, g, bt, mu, var in zip(
        tp["fpn_w"], tp["fpn_b"], tp["bn_g"], tp["bn_b"], tp["bn_m"], tp["bn_v"]
    ):
        scale = g / jnp.sqrt(var + eps)                               # (Cout,)
        w_f = w * scale[:, None, None, None]                          # (O,I,3,3)
        b_f = (b - mu) * scale + bt
        w9 = jnp.transpose(w_f, (2, 3, 1, 0)).reshape(9, w.shape[1], w.shape[0])
        fpn.append((w9, b_f))
    return {"lateral": lateral, "fpn": fpn}


def fpn_top_down(inputs_nchw, kparams):
    """Pallas implementation of FpnTopDown.forward (inputs/outputs NCHW)."""
    n = len(inputs_nchw)
    # NCHW -> NHWC: layout plumbing stays in XLA, kernels stay lane-dense.
    xs = [jnp.transpose(x, (0, 2, 3, 1)) for x in inputs_nchw]
    lateral_outs = [
        pointwise_conv(xs[i], kparams["lateral"][i][0], kparams["lateral"][i][1])
        for i in range(n)
    ]
    features = [lateral_outs[-1]]
    for i in range(n - 1, 0, -1):
        features.append(upsample_add(features[-1], lateral_outs[i - 1]))
    extract = [
        conv3x3_bn_relu(features[-(i + 1)], kparams["fpn"][i][0], kparams["fpn"][i][1])
        for i in range(n)
    ]
    return [jnp.transpose(f, (0, 3, 1, 2)) for f in extract]          # back to NCHW


# --------------------------------------------------------------------------
# Pure-JAX reference (independent of the Pallas kernels).
# --------------------------------------------------------------------------
def _reference(inputs, tp, eps=_EPS):
    n = len(inputs)
    hi = jax.lax.Precision.HIGHEST

    def conv(x, w, b, pad):
        y = jax.lax.conv_general_dilated(
            x, w, window_strides=(1, 1), padding=[(pad, pad), (pad, pad)],
            dimension_numbers=("NCHW", "OIHW", "NCHW"), precision=hi)
        return y + b[None, :, None, None]

    lateral_outs = [conv(inputs[i], tp["lat_w"][i], tp["lat_b"][i], 0) for i in range(n)]
    features = [lateral_outs[-1]]
    for i in range(n - 1, 0, -1):
        top = features[-1]
        Ht, Wt = lateral_outs[i - 1].shape[2], lateral_outs[i - 1].shape[3]
        rh = jnp.asarray(_build_interp_matrix(Ht, top.shape[2]))
        rw = jnp.asarray(_build_interp_matrix(Wt, top.shape[3]))
        up = jnp.einsum("th,bchw->bctw", rh, top, precision=hi)
        up = jnp.einsum("uw,bctw->bctu", rw, up, precision=hi)
        features.append(up + lateral_outs[i - 1])
    outs = []
    for i in range(n):
        f = features[-(i + 1)]
        y = conv(f, tp["fpn_w"][i], tp["fpn_b"][i], 1)
        g, bt, mu, var = tp["bn_g"][i], tp["bn_b"][i], tp["bn_m"][i], tp["bn_v"][i]
        y = (y - mu[None, :, None, None]) * (g / jnp.sqrt(var + eps))[None, :, None, None] \
            + bt[None, :, None, None]
        outs.append(jnp.maximum(y, 0.0))
    return outs


# --------------------------------------------------------------------------
# Demo / self-test.
# --------------------------------------------------------------------------
def _make_torch_params(key, in_channel_list, out_channels):
    tp = {"lat_w": [], "lat_b": [], "fpn_w": [], "fpn_b": [],
          "bn_g": [], "bn_b": [], "bn_m": [], "bn_v": []}
    for cin in in_channel_list:
        key, k1, k2 = jax.random.split(key, 3)
        tp["lat_w"].append(
            jax.random.normal(k1, (out_channels, cin, 1, 1), jnp.float32) / np.sqrt(cin))
        tp["lat_b"].append(jax.random.normal(k2, (out_channels,), jnp.float32) * 0.1)
    for _ in in_channel_list:
        key, k1, k2, k3, k4, k5, k6 = jax.random.split(key, 7)
        tp["fpn_w"].append(
            jax.random.normal(k1, (out_channels, out_channels, 3, 3), jnp.float32)
            / np.sqrt(9.0 * out_channels))
        tp["fpn_b"].append(jax.random.normal(k2, (out_channels,), jnp.float32) * 0.1)
        tp["bn_g"].append(jax.random.uniform(k3, (out_channels,), jnp.float32, 0.5, 1.5))
        tp["bn_b"].append(jax.random.normal(k4, (out_channels,), jnp.float32) * 0.1)
        tp["bn_m"].append(jax.random.normal(k5, (out_channels,), jnp.float32) * 0.1)
        tp["bn_v"].append(jax.random.uniform(k6, (out_channels,), jnp.float32, 0.5, 1.5))
    return tp


if __name__ == "__main__":
    key = jax.random.PRNGKey(0)

    B = 2
    in_channel_list = [32, 64, 128]
    out_channels = 128                      # lane-dense (128) channel axis
    spatial = [16, 8, 4]                    # high-res -> low-res, FPN style

    key, kp = jax.random.split(key)
    tparams = _make_torch_params(kp, in_channel_list, out_channels)

    inputs = []
    for cin, s in zip(in_channel_list, spatial):
        key, kx = jax.random.split(key)
        inputs.append(jax.random.normal(kx, (B, cin, s, s), jnp.float32))

    kparams = prepare_kernel_params(tparams)

    outs = fpn_top_down(inputs, kparams)
    outs = [o.block_until_ready() for o in outs]

    refs = _reference(inputs, tparams)
    expected_spatial = [16, 8, 4]           # features[-(i+1)] order
    for i, (o, r) in enumerate(zip(outs, refs)):
        s = expected_spatial[i]
        assert o.shape == (B, out_channels, s, s), o.shape
        assert jnp.allclose(o, r, atol=2e-3, rtol=2e-3), \
            f"level {i}: max abs err {float(jnp.max(jnp.abs(o - r)))}"

    print("KERNEL_OK")
</pallas_src>

<mosaic_0001>
module attributes {stable_mosaic.version = 11 : i64} {
  func.func @_pointwise_kernel(%arg0: i32, %arg1: memref<512x32xf32, #tpu.memory_space<vmem>>, %arg2: memref<32x128xf32, #tpu.memory_space<vmem>>, %arg3: memref<1x128xf32, #tpu.memory_space<vmem>>, %arg4: memref<512x128xf32, #tpu.memory_space<vmem>>) attributes {dimension_semantics = [#tpu.dimension_semantics<parallel>], iteration_bounds = array<i64: 1>, scalar_prefetch = 0 : i64, scratch_operands = 0 : i64, tpu.core_type = #tpu.core_type<tc>, window_params = [{transform_indices = @transform_0, window_bounds = array<i64: 512, 32>}, {pipeline_mode = #tpu.pipeline_mode<synchronous>, transform_indices = @transform_1, window_bounds = array<i64: 32, 128>}, {pipeline_mode = #tpu.pipeline_mode<synchronous>, transform_indices = @transform_2, window_bounds = array<i64: 1, 128>}, {transform_indices = @transform_3, window_bounds = array<i64: 512, 128>}]} {
    %c0 = arith.constant 0 : index
    %c0_0 = arith.constant 0 : index
    %0 = vector.load %arg1[%c0, %c0_0] : memref<512x32xf32, #tpu.memory_space<vmem>>, vector<512x32xf32>
    %c0_1 = arith.constant 0 : index
    %c0_2 = arith.constant 0 : index
    %1 = vector.load %arg2[%c0_1, %c0_2] : memref<32x128xf32, #tpu.memory_space<vmem>>, vector<32x128xf32>
    %cst = arith.constant dense<0.000000e+00> : vector<512x128xf32>
    %2 = tpu.matmul %0, %1, %cst {dimension_numbers = #tpu.dot_dimension_numbers<[1], [0], [0], [1], [0, 0, 1, 1], [], []>} : vector<512x32xf32>, vector<32x128xf32>, vector<512x128xf32> -> vector<512x128xf32>
    %c0_3 = arith.constant 0 : index
    %c0_4 = arith.constant 0 : index
    %3 = vector.load %arg3[%c0_3, %c0_4] : memref<1x128xf32, #tpu.memory_space<vmem>>, vector<1x128xf32>
    %4 = vector.broadcast %3 : vector<1x128xf32> to vector<512x128xf32>
    %5 = arith.addf %2, %4 : vector<512x128xf32>
    %c0_5 = arith.constant 0 : index
    %c0_6 = arith.constant 0 : index
    %6 = vector.load %arg4[%c0_5, %c0_6] : memref<512x128xf32, #tpu.memory_space<vmem>>, vector<512x128xf32>
    tpu.vector_store %arg4[%c0_5, %c0_6], %5 {strides = array<i32>} : memref<512x128xf32, #tpu.memory_space<vmem>>, vector<512x128xf32>,
    return
  }
  func.func @transform_0(%arg0: i32) -> (i32, i32) {
    %c0_i32 = arith.constant 0 : i32
    %c0_i32_0 = arith.constant 0 : i32
    return %arg0, %c0_i32 : i32, i32
  }
  func.func @transform_1(%arg0: i32) -> (i32, i32) {
    %c0_i32 = arith.constant 0 : i32
    %c0_i32_0 = arith.constant 0 : i32
    %c0_i32_1 = arith.constant 0 : i32
    return %c0_i32, %c0_i32_0 : i32, i32
  }
  func.func @transform_2(%arg0: i32) -> (i32, i32) {
    %c0_i32 = arith.constant 0 : i32
    %c0_i32_0 = arith.constant 0 : i32
    %c0_i32_1 = arith.constant 0 : i32
    return %c0_i32, %c0_i32_0 : i32, i32
  }
  func.func @transform_3(%arg0: i32) -> (i32, i32) {
    %c0_i32 = arith.constant 0 : i32
    %c0_i32_0 = arith.constant 0 : i32
    return %arg0, %c0_i32 : i32, i32
  }
}

</mosaic_0001>

<bundles_post_ra>
// kernel: tpu_custom_call.1
= control target key start
LH: loop header
LB: loop body
LE: loop exit
PB: predicated region body
PF: predicated region fallthrough
CT: control target
= control target key end

     0   :  { %vm90_vm0 = vcmask 261120   ;;  %s1381_s0 = inlined_call_operand.vmem [shape: f32[512,32], index: 0, kind: input, shape index: {}]   ;;  %s1382_s1 = inlined_call_operand.vmem [shape: f32[32,128], index: 1, kind: input, shape index: {}]   ;;  %s1383_s2 = inlined_call_operand.vmem [shape: f32[1,128], index: 2, kind: input, shape index: {}]   ;;  %s1384_s3 = inlined_call_operand.hbm [shape: f32[512,128], index: 3, kind: output, shape index: {}]  }
   0x1   :  { %v82_v0 = vld [vmem:[%s1382_s1 + $0x18] sm:$0xff]  ;;  %v81_v1 = vld [vmem:[%s1382_s1 + $0x10] sm:$0xff]  ;;  %v80_v2 = vld [vmem:[%s1382_s1 + $0x8] sm:$0xff] }
   0x2   :  { %881 = vmatprep.subr.mxu0 %v82_v0  ;;  %985 = vmatprep.subr.mxu1 %v82_v0  ;;  %v79_v3 = vld [vmem:[%s1382_s1] sm:$0xff]  ;;  %v16_v6 = vld [vmem:[%s1381_s0 + $0x8] sm:$0xff]  ;;  %v17_v8 = vld [vmem:[%s1381_s0 + $0x10] sm:$0xff] }
   0x3   :  { %882 = vmatpush3.msra.mxu0 %v82_v0  ;;  %989 = vmatpush3.msra.mxu1 %v82_v0  ;;  %v15_v4 = vld [vmem:[%s1381_s0] sm:$0xff]  ;;  %v48_v7 = vld [vmem:[%s1381_s0 + $0x108] sm:$0xff]  ;;  %v49_v9 = vld [vmem:[%s1381_s0 + $0x110] sm:$0xff] }
   0x4   :  { %883 = vmatprep.subr.mxu0 %v81_v1  ;;  %986 = vmatprep.subr.mxu1 %v81_v1  ;;  %v47_v5 = vld [vmem:[%s1381_s0 + $0x100] sm:$0xff]  ;;  %v18_v10 = vld [vmem:[%s1381_s0 + $0x18] sm:$0xff]  ;;  %v20_v14 = vld [vmem:[%s1381_s0 + $0x28] sm:$0xff] }
   0x5   :  { %884 = vmatpush3.msra.mxu0 %v81_v1  ;;  %990 = vmatpush3.msra.mxu1 %v81_v1  ;;  %v50_v11 = vld [vmem:[%s1381_s0 + $0x118] sm:$0xff]  ;;  %v19_v12 = vld [vmem:[%s1381_s0 + $0x20] sm:$0xff]  ;;  %v52_v15 = vld [vmem:[%s1381_s0 + $0x128] sm:$0xff] }
   0x6   :  { %885 = vmatprep.subr.mxu0 %v80_v2  ;;  %987 = vmatprep.subr.mxu1 %v80_v2  ;;  %v51_v13 = vld [vmem:[%s1381_s0 + $0x120] sm:$0xff]  ;;  %v21_v16 = vld [vmem:[%s1381_s0 + $0x30] sm:$0xff]  ;;  %v22_v18 = vld [vmem:[%s1381_s0 + $0x38] sm:$0xff] }
   0x7   :  { %886 = vmatpush3.msra.mxu0 %v80_v2  ;;  %991 = vmatpush3.msra.mxu1 %v80_v2  ;;  %v53_v17 = vld [vmem:[%s1381_s0 + $0x130] sm:$0xff]  ;;  %v54_v19 = vld [vmem:[%s1381_s0 + $0x138] sm:$0xff]  ;;  %v23_v20 = vld [vmem:[%s1381_s0 + $0x40] sm:$0xff] }
   0x8   :  { %887 = vmatprep.subr.mxu0 %v79_v3  ;;  %988 = vmatprep.subr.mxu1 %v79_v3  ;;  %v55_v21 = vld [vmem:[%s1381_s0 + $0x140] sm:$0xff] }
   0x9   :  { %888 = vmatpush3.msra.mxu0 %v79_v3  ;;  %992 = vmatpush3.msra.mxu1 %v79_v3 }
   0xa   :  { %889 = vmatprep.mubr.msk.f32.mxu0 %vm90_vm0, %v15_v4  ;;  %937 = vmatprep.mubr.msk.f32.mxu1 %vm90_vm0, %v47_v5 }
   0xb   :  { %890 = vmatmul.mubr.msk.f32.vlgmr.msra.gmra.mxu0 %vm90_vm0, %v16_v6  ;;  %938 = vmatmul.mubr.msk.f32.vlgmr.msra.gmra.mxu1 %vm90_vm0, %v48_v7 }
   0xc   :  { %892 = vmatprep.mubr.msk.f32.mxu0 %vm90_vm0, %v17_v8  ;;  %940 = vmatprep.mubr.msk.f32.mxu1 %vm90_vm0, %v49_v9 }
   0xf   :  { %893 = vmatmul.mubr.msk.f32.gmra.mxu0 %vm90_vm0, %v18_v10  ;;  %941 = vmatmul.mubr.msk.f32.gmra.mxu1 %vm90_vm0, %v50_v11 }
  0x10   :  { %895 = vmatprep.mubr.msk.f32.mxu0 %vm90_vm0, %v19_v12  ;;  %943 = vmatprep.mubr.msk.f32.mxu1 %vm90_vm0, %v51_v13 }
  0x13   :  { %896 = vmatmul.mubr.msk.f32.gmra.mxu0 %vm90_vm0, %v20_v14  ;;  %944 = vmatmul.mubr.msk.f32.gmra.mxu1 %vm90_vm0, %v52_v15 }
  0x14   :  { %898 = vmatprep.mubr.msk.f32.mxu0 %vm90_vm0, %v21_v16  ;;  %946 = vmatprep.mubr.msk.f32.mxu1 %vm90_vm0, %v53_v17 }
  0x17   :  { %899 = vmatmul.mubr.msk.f32.gmra.mxu0 %vm90_vm0, %v22_v18  ;;  %947 = vmatmul.mubr.msk.f32.gmra.mxu1 %vm90_vm0, %v54_v19 }
  0x18   :  { %8 = vsyncpa [#allocation3], 0  ;;  %901 = vmatprep.mubr.msk.f32.mxu0 %vm90_vm0, %v23_v20  ;;  %949 = vmatprep.mubr.msk.f32.mxu1 %vm90_vm0, %v55_v21  ;;  %v24_v22 = vld [vmem:[%s1381_s0 + $0x48] sm:$0xff]  ;;  %v25_v24 = vld [vmem:[%s1381_s0 + $0x50] sm:$0xff] }
  0x19   :  { %v56_v23 = vld [vmem:[%s1381_s0 + $0x148] sm:$0xff]  ;;  %v57_v25 = vld [vmem:[%s1381_s0 + $0x150] sm:$0xff]  ;;  %v26_v26 = vld [vmem:[%s1381_s0 + $0x58] sm:$0xff] }
  0x1a   :  { %v58_v27 = vld [vmem:[%s1381_s0 + $0x158] sm:$0xff]  ;;  %v27_v28 = vld [vmem:[%s1381_s0 + $0x60] sm:$0xff]  ;;  %v28_v30 = vld [vmem:[%s1381_s0 + $0x68] sm:$0xff] }
  0x1b   :  { %902 = vmatmul.mubr.msk.f32.gmra.mxu0 %vm90_vm0, %v24_v22  ;;  %950 = vmatmul.mubr.msk.f32.gmra.mxu1 %vm90_vm0, %v56_v23  ;;  %v59_v29 = vld [vmem:[%s1381_s0 + $0x160] sm:$0xff]  ;;  %v60_v31 = vld [vmem:[%s1381_s0 + $0x168] sm:$0xff]  ;;  %v29_v32 = vld [vmem:[%s1381_s0 + $0x70] sm:$0xff] }
  0x1c   :  { %904 = vmatprep.mubr.msk.f32.mxu0 %vm90_vm0, %v25_v24  ;;  %952 = vmatprep.mubr.msk.f32.mxu1 %vm90_vm0, %v57_v25  ;;  %v61_v33 = vld [vmem:[%s1381_s0 + $0x170] sm:$0xff]  ;;  %v30_v34 = vld [vmem:[%s1381_s0 + $0x78] sm:$0xff]  ;;  %v31_v36 = vld [vmem:[%s1381_s0 + $0x80] sm:$0xff] }
  0x1d   :  { %v62_v35 = vld [vmem:[%s1381_s0 + $0x178] sm:$0xff]  ;;  %v63_v37 = vld [vmem:[%s1381_s0 + $0x180] sm:$0xff]  ;;  %v32_v38 = vld [vmem:[%s1381_s0 + $0x88] sm:$0xff] }
  0x1e   :  { %v64_v39 = vld [vmem:[%s1381_s0 + $0x188] sm:$0xff]  ;;  %v33_v40 = vld [vmem:[%s1381_s0 + $0x90] sm:$0xff]  ;;  %v34_v42 = vld [vmem:[%s1381_s0 + $0x98] sm:$0xff] }
  0x1f   :  { %905 = vmatmul.mubr.msk.f32.gmra.mxu0 %vm90_vm0, %v26_v26  ;;  %953 = vmatmul.mubr.msk.f32.gmra.mxu1 %vm90_vm0, %v58_v27  ;;  %v65_v41 = vld [vmem:[%s1381_s0 + $0x190] sm:$0xff]  ;;  %v66_v43 = vld [vmem:[%s1381_s0 + $0x198] sm:$0xff]  ;;  %v35_v44 = vld [vmem:[%s1381_s0 + $0xa0] sm:$0xff] }
  0x20   :  { %907 = vmatprep.mubr.msk.f32.mxu0 %vm90_vm0, %v27_v28  ;;  %955 = vmatprep.mubr.msk.f32.mxu1 %vm90_vm0, %v59_v29  ;;  %v67_v45 = vld [vmem:[%s1381_s0 + $0x1a0] sm:$0xff]  ;;  %v36_v46 = vld [vmem:[%s1381_s0 + $0xa8] sm:$0xff]  ;;  %v37_v48 = vld [vmem:[%s1381_s0 + $0xb0] sm:$0xff] }
  0x21   :  { %v68_v47 = vld [vmem:[%s1381_s0 + $0x1a8] sm:$0xff]  ;;  %v69_v49 = vld [vmem:[%s1381_s0 + $0x1b0] sm:$0xff]  ;;  %v38_v50 = vld [vmem:[%s1381_s0 + $0xb8] sm:$0xff] }
  0x22   :  { %v70_v51 = vld [vmem:[%s1381_s0 + $0x1b8] sm:$0xff]  ;;  %v39_v52 = vld [vmem:[%s1381_s0 + $0xc0] sm:$0xff]  ;;  %v40_v54 = vld [vmem:[%s1381_s0 + $0xc8] sm:$0xff] }
  0x23   :  { %908 = vmatmul.mubr.msk.f32.gmra.mxu0 %vm90_vm0, %v28_v30  ;;  %956 = vmatmul.mubr.msk.f32.gmra.mxu1 %vm90_vm0, %v60_v31  ;;  %v71_v53 = vld [vmem:[%s1381_s0 + $0x1c0] sm:$0xff]  ;;  %v72_v55 = vld [vmem:[%s1381_s0 + $0x1c8] sm:$0xff]  ;;  %v41_v56 = vld [vmem:[%s1381_s0 + $0xd0] sm:$0xff] }
  0x24   :  { %910 = vmatprep.mubr.msk.f32.mxu0 %vm90_vm0, %v29_v32  ;;  %958 = vmatprep.mubr.msk.f32.mxu1 %vm90_vm0, %v61_v33  ;;  %v73_v57 = vld [vmem:[%s1381_s0 + $0x1d0] sm:$0xff]  ;;  %v42_v58 = vld [vmem:[%s1381_s0 + $0xd8] sm:$0xff]  ;;  %v43_v60 = vld [vmem:[%s1381_s0 + $0xe0] sm:$0xff] }
  0x25   :  { %v74_v59 = vld [vmem:[%s1381_s0 + $0x1d8] sm:$0xff]  ;;  %v75_v61 = vld [vmem:[%s1381_s0 + $0x1e0] sm:$0xff]  ;;  %v44_v62 = vld [vmem:[%s1381_s0 + $0xe8] sm:$0xff] }
  0x26   :  { %v76_v63 = vld [vmem:[%s1381_s0 + $0x1e8] sm:$0xff]  ;;  %v45_v0 = vld [vmem:[%s1381_s0 + $0xf0] sm:$0xff]  ;;  %v46_v2 = vld [vmem:[%s1381_s0 + $0xf8] sm:$0xff] }
  0x27   :  { %911 = vmatmul.mubr.msk.f32.gmra.mxu0 %vm90_vm0, %v30_v34  ;;  %959 = vmatmul.mubr.msk.f32.gmra.mxu1 %vm90_vm0, %v62_v35  ;;  %v77_v1 = vld [vmem:[%s1381_s0 + $0x1f0] sm:$0xff]  ;;  %v78_v3 = vld [vmem:[%s1381_s0 + $0x1f8] sm:$0xff]  ;;  %v1312_v4 = vld [vmem:[%s1383_s2] ss:$0 sm:$0xff]  ;;  %s1018_s0 = smov [#allocation2]  }
  0x28   :  { %913 = vmatprep.mubr.msk.f32.mxu0 %vm90_vm0, %v31_v36  ;;  %961 = vmatprep.mubr.msk.f32.mxu1 %vm90_vm0, %v63_v37  ;;  %s737_s2 = sshll.u32 %s1018_s0, 4  ;;  %s738_s2 = int_to_ptr.vmem [resolvable:$true] %s737_s2 }
  0x29   :  { %s996_s10 = scalar_lea.vmem %s738_s2, 8192  ;;  %p1001_p1 = scmp.lt.s32.totalorder %s738_s2, %s738_s2 }
  0x2a   :  { %p997_p0 = scmp.ne.s32.totalorder %s738_s2, %s996_s10  ;;  %p1002_p2 = scmp.lt.s32.totalorder %s996_s10, %s996_s10 }
  0x2b   :  { %914 = vmatmul.mubr.msk.f32.gmra.mxu0 %vm90_vm0, %v32_v38  ;;  %962 = vmatmul.mubr.msk.f32.gmra.mxu1 %vm90_vm0, %v64_v39 }
  0x2c   :  { %916 = vmatprep.mubr.msk.f32.mxu0 %vm90_vm0, %v33_v40  ;;  %964 = vmatprep.mubr.msk.f32.mxu1 %vm90_vm0, %v65_v41  ;;  %p1003_p3 = por %p1002_p2, %p1001_p1 }
  0x2e   :  { %p1004_p4 = pnand %p1003_p3, %p997_p0 }
  0x2f   :  { %917 = vmatmul.mubr.msk.f32.gmra.mxu0 %vm90_vm0, %v34_v42  ;;  %965 = vmatmul.mubr.msk.f32.gmra.mxu1 %vm90_vm0, %v66_v43 }
  0x30   :  { %919 = vmatprep.mubr.msk.f32.mxu0 %vm90_vm0, %v35_v44  ;;  %967 = vmatprep.mubr.msk.f32.mxu1 %vm90_vm0, %v67_v45 }
  0x33   :  { %920 = vmatmul.mubr.msk.f32.gmra.mxu0 %vm90_vm0, %v36_v46  ;;  %968 = vmatmul.mubr.msk.f32.gmra.mxu1 %vm90_vm0, %v68_v47 }
  0x34   :  { %922 = vmatprep.mubr.msk.f32.mxu0 %vm90_vm0, %v37_v48  ;;  %970 = vmatprep.mubr.msk.f32.mxu1 %vm90_vm0, %v69_v49 }
  0x37   :  { %923 = vmatmul.mubr.msk.f32.gmra.mxu0 %vm90_vm0, %v38_v50  ;;  %971 = vmatmul.mubr.msk.f32.gmra.mxu1 %vm90_vm0, %v70_v51 }
  0x38   :  { %925 = vmatprep.mubr.msk.f32.mxu0 %vm90_vm0, %v39_v52  ;;  %973 = vmatprep.mubr.msk.f32.mxu1 %vm90_vm0, %v71_v53 }
  0x3b   :  { %926 = vmatmul.mubr.msk.f32.gmra.mxu0 %vm90_vm0, %v40_v54  ;;  %974 = vmatmul.mubr.msk.f32.gmra.mxu1 %vm90_vm0, %v72_v55 }
  0x3c   :  { %928 = vmatprep.mubr.msk.f32.mxu0 %vm90_vm0, %v41_v56  ;;  %976 = vmatprep.mubr.msk.f32.mxu1 %vm90_vm0, %v73_v57 }
  0x3f   :  { %929 = vmatmul.mubr.msk.f32.gmra.mxu0 %vm90_vm0, %v42_v58  ;;  %977 = vmatmul.mubr.msk.f32.gmra.mxu1 %vm90_vm0, %v74_v59 }
  0x40   :  { %931 = vmatprep.mubr.msk.f32.mxu0 %vm90_vm0, %v43_v60  ;;  %979 = vmatprep.mubr.msk.f32.mxu1 %vm90_vm0, %v75_v61 }
  0x43   :  { %932 = vmatmul.mubr.msk.f32.gmra.mxu0 %vm90_vm0, %v44_v62  ;;  %980 = vmatmul.mubr.msk.f32.gmra.mxu1 %vm90_vm0, %v76_v63 }
  0x44   :  { %934 = vmatprep.mubr.msk.f32.mxu0 %vm90_vm0, %v45_v0  ;;  %982 = vmatprep.mubr.msk.f32.mxu1 %vm90_vm0, %v77_v1 }
  0x47   :  { %935 = vmatmul.mubr.msk.f32.gmra.mxu0 %vm90_vm0, %v46_v2  ;;  %983 = vmatmul.mubr.msk.f32.gmra.mxu1 %vm90_vm0, %v78_v3 }
  0xcb   :  { %v891_v5 = vpop.f32.mrf.mxu0  ;;  %v939_v6 = vpop.f32.mrf.mxu1 }
  0xcc   :  { %v355_v7 = vadd.f32 %v891_v5, %v1312_v4  ;;  %v515_v8 = vadd.f32 %v939_v6, %v1312_v4 }
  0xcd   :  { %v349_v9 = vpop.f32.mrf.mxu0  ;;  %v509_v10 = vpop.f32.mrf.mxu1 }
  0xce   :  { %669 = vst [vmem:[#allocation2 + $0x8] sm:$0xff] %v355_v7  ;;  %701 = vst [vmem:[#allocation2 + $0x108] sm:$0xff] %v515_v8  ;;  %v350_v11 = vadd.f32 %v1312_v4, %v349_v9  ;;  %v510_v12 = vadd.f32 %v1312_v4, %v509_v10 }
  0xcf   :  { %v894_v13 = vpop.f32.mrf.mxu0  ;;  %v942_v14 = vpop.f32.mrf.mxu1 }
  0xd0   :  { %668 = vst [vmem:[#allocation2] sm:$0xff] %v350_v11  ;;  %700 = vst [vmem:[#allocation2 + $0x100] sm:$0xff] %v510_v12  ;;  %v365_v15 = vadd.f32 %v894_v13, %v1312_v4  ;;  %v525_v16 = vadd.f32 %v942_v14, %v1312_v4 }
  0xd1   :  { %v359_v17 = vpop.f32.mrf.mxu0  ;;  %v519_v18 = vpop.f32.mrf.mxu1 }
  0xd2   :  { %671 = vst [vmem:[#allocation2 + $0x18] sm:$0xff] %v365_v15  ;;  %703 = vst [vmem:[#allocation2 + $0x118] sm:$0xff] %v525_v16  ;;  %v360_v19 = vadd.f32 %v1312_v4, %v359_v17  ;;  %v520_v20 = vadd.f32 %v1312_v4, %v519_v18 }
  0xd3   :  { %v897_v21 = vpop.f32.mrf.mxu0  ;;  %v945_v22 = vpop.f32.mrf.mxu1 }
  0xd4   :  { %670 = vst [vmem:[#allocation2 + $0x10] sm:$0xff] %v360_v19  ;;  %702 = vst [vmem:[#allocation2 + $0x110] sm:$0xff] %v520_v20  ;;  %v375_v23 = vadd.f32 %v897_v21, %v1312_v4  ;;  %v535_v24 = vadd.f32 %v945_v22, %v1312_v4 }
  0xd5   :  { %v369_v25 = vpop.f32.mrf.mxu0  ;;  %v529_v26 = vpop.f32.mrf.mxu1 }
  0xd6   :  { %673 = vst [vmem:[#allocation2 + $0x28] sm:$0xff] %v375_v23  ;;  %705 = vst [vmem:[#allocation2 + $0x128] sm:$0xff] %v535_v24  ;;  %v370_v27 = vadd.f32 %v1312_v4, %v369_v25  ;;  %v530_v28 = vadd.f32 %v1312_v4, %v529_v26 }
  0xd7   :  { %v900_v29 = vpop.f32.mrf.mxu0  ;;  %v948_v30 = vpop.f32.mrf.mxu1 }
  0xd8   :  { %672 = vst [vmem:[#allocation2 + $0x20] sm:$0xff] %v370_v27  ;;  %704 = vst [vmem:[#allocation2 + $0x120] sm:$0xff] %v530_v28  ;;  %v385_v31 = vadd.f32 %v900_v29, %v1312_v4  ;;  %v545_v32 = vadd.f32 %v948_v30, %v1312_v4 }
  0xd9   :  { %v379_v33 = vpop.f32.mrf.mxu0  ;;  %v539_v34 = vpop.f32.mrf.mxu1 }
  0xda   :  { %675 = vst [vmem:[#allocation2 + $0x38] sm:$0xff] %v385_v31  ;;  %707 = vst [vmem:[#allocation2 + $0x138] sm:$0xff] %v545_v32  ;;  %v380_v35 = vadd.f32 %v1312_v4, %v379_v33  ;;  %v540_v36 = vadd.f32 %v1312_v4, %v539_v34 }
  0xdb   :  { %v903_v37 = vpop.f32.mrf.mxu0  ;;  %v951_v38 = vpop.f32.mrf.mxu1 }
  0xdc   :  { %674 = vst [vmem:[#allocation2 + $0x30] sm:$0xff] %v380_v35  ;;  %706 = vst [vmem:[#allocation2 + $0x130] sm:$0xff] %v540_v36  ;;  %v395_v39 = vadd.f32 %v903_v37, %v1312_v4  ;;  %v555_v40 = vadd.f32 %v951_v38, %v1312_v4 }
  0xdd   :  { %v389_v41 = vpop.f32.mrf.mxu0  ;;  %v549_v42 = vpop.f32.mrf.mxu1 }
  0xde   :  { %677 = vst [vmem:[#allocation2 + $0x48] sm:$0xff] %v395_v39  ;;  %709 = vst [vmem:[#allocation2 + $0x148] sm:$0xff] %v555_v40  ;;  %v390_v43 = vadd.f32 %v1312_v4, %v389_v41  ;;  %v550_v44 = vadd.f32 %v1312_v4, %v549_v42 }
  0xdf   :  { %v906_v45 = vpop.f32.mrf.mxu0  ;;  %v954_v46 = vpop.f32.mrf.mxu1 }
  0xe0   :  { %676 = vst [vmem:[#allocation2 + $0x40] sm:$0xff] %v390_v43  ;;  %708 = vst [vmem:[#allocation2 + $0x140] sm:$0xff] %v550_v44  ;;  %v405_v47 = vadd.f32 %v906_v45, %v1312_v4  ;;  %v565_v48 = vadd.f32 %v954_v46, %v1312_v4 }
  0xe1   :  { %v399_v49 = vpop.f32.mrf.mxu0  ;;  %v559_v50 = vpop.f32.mrf.mxu1 }
  0xe2   :  { %679 = vst [vmem:[#allocation2 + $0x58] sm:$0xff] %v405_v47  ;;  %711 = vst [vmem:[#allocation2 + $0x158] sm:$0xff] %v565_v48  ;;  %v400_v51 = vadd.f32 %v1312_v4, %v399_v49  ;;  %v560_v52 = vadd.f32 %v1312_v4, %v559_v50 }
  0xe3   :  { %v909_v53 = vpop.f32.mrf.mxu0  ;;  %v957_v54 = vpop.f32.mrf.mxu1 }
  0xe4   :  { %678 = vst [vmem:[#allocation2 + $0x50] sm:$0xff] %v400_v51  ;;  %710 = vst [vmem:[#allocation2 + $0x150] sm:$0xff] %v560_v52  ;;  %v415_v55 = vadd.f32 %v909_v53, %v1312_v4  ;;  %v575_v56 = vadd.f32 %v957_v54, %v1312_v4 }
  0xe5   :  { %v409_v57 = vpop.f32.mrf.mxu0  ;;  %v569_v58 = vpop.f32.mrf.mxu1 }
  0xe6   :  { %681 = vst [vmem:[#allocation2 + $0x68] sm:$0xff] %v415_v55  ;;  %713 = vst [vmem:[#allocation2 + $0x168] sm:$0xff] %v575_v56  ;;  %v410_v59 = vadd.f32 %v1312_v4, %v409_v57  ;;  %v570_v60 = vadd.f32 %v1312_v4, %v569_v58 }
  0xe7   :  { %v912_v61 = vpop.f32.mrf.mxu0  ;;  %v960_v62 = vpop.f32.mrf.mxu1 }
  0xe8   :  { %680 = vst [vmem:[#allocation2 + $0x60] sm:$0xff] %v410_v59  ;;  %712 = vst [vmem:[#allocation2 + $0x160] sm:$0xff] %v570_v60  ;;  %v425_v63 = vadd.f32 %v912_v61, %v1312_v4  ;;  %v585_v0 = vadd.f32 %v960_v62, %v1312_v4 }
  0xe9   :  { %v419_v1 = vpop.f32.mrf.mxu0  ;;  %v579_v2 = vpop.f32.mrf.mxu1 }
  0xea   :  { %683 = vst [vmem:[#allocation2 + $0x78] sm:$0xff] %v425_v63  ;;  %715 = vst [vmem:[#allocation2 + $0x178] sm:$0xff] %v585_v0  ;;  %v420_v3 = vadd.f32 %v1312_v4, %v419_v1  ;;  %v580_v5 = vadd.f32 %v1312_v4, %v579_v2 }
  0xeb   :  { %v915_v6 = vpop.f32.mrf.mxu0  ;;  %v963_v7 = vpop.f32.mrf.mxu1 }
  0xec   :  { %682 = vst [vmem:[#allocation2 + $0x70] sm:$0xff] %v420_v3  ;;  %714 = vst [vmem:[#allocation2 + $0x170] sm:$0xff] %v580_v5  ;;  %v435_v8 = vadd.f32 %v915_v6, %v1312_v4  ;;  %v595_v9 = vadd.f32 %v963_v7, %v1312_v4 }
  0xed   :  { %v429_v10 = vpop.f32.mrf.mxu0  ;;  %v589_v11 = vpop.f32.mrf.mxu1 }
  0xee   :  { %685 = vst [vmem:[#allocation2 + $0x88] sm:$0xff] %v435_v8  ;;  %717 = vst [vmem:[#allocation2 + $0x188] sm:$0xff] %v595_v9  ;;  %v430_v12 = vadd.f32 %v1312_v4, %v429_v10  ;;  %v590_v13 = vadd.f32 %v1312_v4, %v589_v11 }
  0xef   :  { %v918_v14 = vpop.f32.mrf.mxu0  ;;  %v966_v15 = vpop.f32.mrf.mxu1 }
  0xf0   :  { %684 = vst [vmem:[#allocation2 + $0x80] sm:$0xff] %v430_v12  ;;  %716 = vst [vmem:[#allocation2 + $0x180] sm:$0xff] %v590_v13  ;;  %v445_v16 = vadd.f32 %v918_v14, %v1312_v4  ;;  %v605_v17 = vadd.f32 %v966_v15, %v1312_v4 }
  0xf1   :  { %v439_v18 = vpop.f32.mrf.mxu0  ;;  %v599_v19 = vpop.f32.mrf.mxu1 }
  0xf2   :  { %687 = vst [vmem:[#allocation2 + $0x98] sm:$0xff] %v445_v16  ;;  %719 = vst [vmem:[#allocation2 + $0x198] sm:$0xff] %v605_v17  ;;  %v440_v20 = vadd.f32 %v1312_v4, %v439_v18  ;;  %v600_v21 = vadd.f32 %v1312_v4, %v599_v19 }
  0xf3   :  { %v921_v22 = vpop.f32.mrf.mxu0  ;;  %v969_v23 = vpop.f32.mrf.mxu1 }
  0xf4   :  { %686 = vst [vmem:[#allocation2 + $0x90] sm:$0xff] %v440_v20  ;;  %718 = vst [vmem:[#allocation2 + $0x190] sm:$0xff] %v600_v21  ;;  %v455_v24 = vadd.f32 %v921_v22, %v1312_v4  ;;  %v615_v25 = vadd.f32 %v969_v23, %v1312_v4 }
  0xf5   :  { %v449_v26 = vpop.f32.mrf.mxu0  ;;  %v609_v27 = vpop.f32.mrf.mxu1 }
  0xf6   :  { %689 = vst [vmem:[#allocation2 + $0xa8] sm:$0xff] %v455_v24  ;;  %721 = vst [vmem:[#allocation2 + $0x1a8] sm:$0xff] %v615_v25  ;;  %v450_v28 = vadd.f32 %v1312_v4, %v449_v26  ;;  %v610_v29 = vadd.f32 %v1312_v4, %v609_v27 }
  0xf7   :  { %v924_v30 = vpop.f32.mrf.mxu0  ;;  %v972_v31 = vpop.f32.mrf.mxu1 }
  0xf8   :  { %688 = vst [vmem:[#allocation2 + $0xa0] sm:$0xff] %v450_v28  ;;  %720 = vst [vmem:[#allocation2 + $0x1a0] sm:$0xff] %v610_v29  ;;  %v465_v32 = vadd.f32 %v924_v30, %v1312_v4  ;;  %v625_v33 = vadd.f32 %v972_v31, %v1312_v4 }
  0xf9   :  { %v459_v34 = vpop.f32.mrf.mxu0  ;;  %v619_v35 = vpop.f32.mrf.mxu1 }
  0xfa   :  { %691 = vst [vmem:[#allocation2 + $0xb8] sm:$0xff] %v465_v32  ;;  %723 = vst [vmem:[#allocation2 + $0x1b8] sm:$0xff] %v625_v33  ;;  %v460_v36 = vadd.f32 %v1312_v4, %v459_v34  ;;  %v620_v37 = vadd.f32 %v1312_v4, %v619_v35 }
  0xfb   :  { %v927_v38 = vpop.f32.mrf.mxu0  ;;  %v975_v39 = vpop.f32.mrf.mxu1 }
  0xfc   :  { %690 = vst [vmem:[#allocation2 + $0xb0] sm:$0xff] %v460_v36  ;;  %722 = vst [vmem:[#allocation2 + $0x1b0] sm:$0xff] %v620_v37  ;;  %v475_v40 = vadd.f32 %v927_v38, %v1312_v4  ;;  %v635_v41 = vadd.f32 %v975_v39, %v1312_v4 }
  0xfd   :  { %v469_v42 = vpop.f32.mrf.mxu0  ;;  %v629_v43 = vpop.f32.mrf.mxu1 }
  0xfe   :  { %693 = vst [vmem:[#allocation2 + $0xc8] sm:$0xff] %v475_v40  ;;  %725 = vst [vmem:[#allocation2 + $0x1c8] sm:$0xff] %v635_v41  ;;  %v470_v44 = vadd.f32 %v1312_v4, %v469_v42  ;;  %v630_v45 = vadd.f32 %v1312_v4, %v629_v43 }
  0xff   :  { %v930_v46 = vpop.f32.mrf.mxu0  ;;  %v978_v47 = vpop.f32.mrf.mxu1 }
 0x100   :  { %692 = vst [vmem:[#allocation2 + $0xc0] sm:$0xff] %v470_v44  ;;  %724 = vst [vmem:[#allocation2 + $0x1c0] sm:$0xff] %v630_v45  ;;  %v485_v48 = vadd.f32 %v930_v46, %v1312_v4  ;;  %v645_v49 = vadd.f32 %v978_v47, %v1312_v4 }
 0x101   :  { %v479_v50 = vpop.f32.mrf.mxu0  ;;  %v639_v51 = vpop.f32.mrf.mxu1 }
 0x102   :  { %695 = vst [vmem:[#allocation2 + $0xd8] sm:$0xff] %v485_v48  ;;  %727 = vst [vmem:[#allocation2 + $0x1d8] sm:$0xff] %v645_v49  ;;  %v480_v52 = vadd.f32 %v1312_v4, %v479_v50  ;;  %v640_v53 = vadd.f32 %v1312_v4, %v639_v51 }
 0x103   :  { %v933_v54 = vpop.f32.mrf.mxu0  ;;  %v981_v55 = vpop.f32.mrf.mxu1 }
 0x104   :  { %694 = vst [vmem:[#allocation2 + $0xd0] sm:$0xff] %v480_v52  ;;  %726 = vst [vmem:[#allocation2 + $0x1d0] sm:$0xff] %v640_v53  ;;  %v495_v56 = vadd.f32 %v933_v54, %v1312_v4  ;;  %v655_v57 = vadd.f32 %v981_v55, %v1312_v4 }
 0x105   :  { %v489_v58 = vpop.f32.mrf.mxu0  ;;  %v649_v59 = vpop.f32.mrf.mxu1 }
 0x106   :  { %697 = vst [vmem:[#allocation2 + $0xe8] sm:$0xff] %v495_v56  ;;  %729 = vst [vmem:[#allocation2 + $0x1e8] sm:$0xff] %v655_v57  ;;  %v490_v60 = vadd.f32 %v1312_v4, %v489_v58  ;;  %v650_v61 = vadd.f32 %v1312_v4, %v649_v59 }
 0x107   :  { %v936_v62 = vpop.f32.mrf.mxu0  ;;  %v984_v63 = vpop.f32.mrf.mxu1 }
 0x108   :  { %696 = vst [vmem:[#allocation2 + $0xe0] sm:$0xff] %v490_v60  ;;  %728 = vst [vmem:[#allocation2 + $0x1e0] sm:$0xff] %v650_v61  ;;  %v505_v0 = vadd.f32 %v936_v62, %v1312_v4  ;;  %v665_v1 = vadd.f32 %v984_v63, %v1312_v4 }
 0x109   :  { %v499_v2 = vpop.f32.mrf.mxu0  ;;  %v659_v3 = vpop.f32.mrf.mxu1 }
 0x10a   :  { %699 = vst [vmem:[#allocation2 + $0xf8] sm:$0xff] %v505_v0  ;;  %731 = vst [vmem:[#allocation2 + $0x1f8] sm:$0xff] %v665_v1  ;;  %v500_v5 = vadd.f32 %v1312_v4, %v499_v2  ;;  %v660_v6 = vadd.f32 %v1312_v4, %v659_v3 }
 0x10c   :  { %698 = vst [vmem:[#allocation2 + $0xf0] sm:$0xff] %v500_v5  ;;  %730 = vst [vmem:[#allocation2 + $0x1f0] sm:$0xff] %v660_v6 }
 0x10d   :  { %1007 = shalt.err (!%p1004_p4)
}
 0x10e   :  { %s1019_s11 = smov 128   ;;  %s1020_s12 = smov 8  }
 0x10f   :  { %743 = dma.vmem_to_hbm [thread:$0]  %s738_s2, 8192, %s1384_s3, [#allocation3], %s1019_s11, %s1019_s11, %s1020_s12  }
 0x110   :  { %1016 = dma.done.wait [#allocation3], 8192  }
 0x111   :  { %1017 = vsyncadd [#allocation3], 4294959104 }
 0x112   :  { %747 = vsyncpa [#allocation3], 1 }

</bundles_post_ra>
